<compile_context>
chip_gen: v7x
topology: tpu7x:2x2x1
jax: 0.10.0
libtpu: 0.0.40
codegen_flags: <defaults>
</compile_context>

<pallas_src>
import jax
import jax.numpy as jnp
from jax import lax
from jax.experimental import pallas as pl
from jax.experimental.pallas import tpu as pltpu

_COS_EPS = 1e-8  # F.cosine_similarity default eps


def _round_up(x, m):
    return (x + m - 1) // m * m


def _sim_kernel(qc_ref, qinv_ref, pc_ref, pinv_ref, sim_ref):
    """One block of query nodes against ALL proto nodes.

    qc_ref   : (BR, C)    bf16 channel-centered query node rows
    qinv_ref : (BR, 1)    f32 per-row inverse node norms
    pc_ref   : (C, WLp)   bf16 channel-centered proto slab (resident, constant index)
    pinv_ref : (1, WLp)   f32 per-column inverse node norms (resident)
    sim_ref  : (BR, WLp)  f32 cosine similarity (lane-dense, WLp multiple of 128)
    """
    dots = jnp.dot(qc_ref[...], pc_ref[...],
                   preferred_element_type=jnp.float32)        # [BR, WLp] on the MXU
    sim_ref[...] = dots * qinv_ref[...] * pinv_ref[...]       # two broadcast VPU muls


def _similarity_pallas(qc_slab, qinv, pc_slab, pinv, block_rows):
    R, C = qc_slab.shape
    WLp = pc_slab.shape[1]
    grid = (R // block_rows,)
    return pl.pallas_call(
        _sim_kernel,
        out_shape=jax.ShapeDtypeStruct((R, WLp), jnp.float32),
        grid_spec=pltpu.PrefetchScalarGridSpec(
            num_scalar_prefetch=0,
            grid=grid,
            in_specs=[
                pl.BlockSpec((block_rows, C), lambda i: (i, 0)),   # query block
                pl.BlockSpec((block_rows, 1), lambda i: (i, 0)),   # query inv norms
                pl.BlockSpec((C, WLp), lambda i: (0, 0)),          # proto slab (resident)
                pl.BlockSpec((1, WLp), lambda i: (0, 0)),          # proto inv norms
            ],
            out_specs=pl.BlockSpec((block_rows, WLp), lambda i: (i, 0)),
        ),
        compiler_params=pltpu.CompilerParams(
            dimension_semantics=("parallel",)),   # shards row blocks across TCs on v7x
    )(qc_slab, qinv, pc_slab, pinv)


def deepemd_meta_forward(support, query, temperature=12.5, block_rows_target=256):
    """DeepEMD_CL.forward with mode='meta'.

    support: [1, way, C, H, W]  (encoder feature maps, NCHW)
    query:   [NQ,  C, H, W]
    Returns (logits, similarity_map, weight_1, weight_2).
    """
    proto = jnp.squeeze(support, axis=0)                  # [way, C, H, W]
    NQ, C, H, W = query.shape
    way = proto.shape[0]
    L = H * W

    q = query.reshape(NQ, C, L).astype(jnp.float32)
    p = proto.reshape(way, C, L).astype(jnp.float32)

    # --- get_weight_vector: tiny batched GEMMs, hoisted to XLA (no MXU waste in-kernel) ---
    p_mean = p.mean(-1)                                    # [way, C]
    q_mean = q.mean(-1)                                    # [NQ, C]
    weight_1 = jnp.maximum(jnp.einsum('qcl,wc->qwl', q, p_mean), 0.0) + 0.001   # [NQ, way, L]
    weight_2 = jnp.maximum(jnp.einsum('wcl,qc->wql', p, q_mean), 0.0) + 0.001   # [way, NQ, L]

    # --- center-normalize (args.norm == 'center') + node-norm stats, hoisted (f32) ---
    qc = q - q.mean(1, keepdims=True)                      # [NQ, C, L]
    pc = p - p.mean(1, keepdims=True)                      # [way, C, L]
    qn2 = jnp.sum(qc * qc, axis=1)                         # [NQ, L]
    pn2 = jnp.sum(pc * pc, axis=1)                         # [way, L]
    # per-norm eps clamp (matches F.cosine_similarity: x / max(||x||, eps))
    qinv = lax.rsqrt(jnp.maximum(qn2, _COS_EPS * _COS_EPS)).reshape(NQ * L, 1)
    pinv = lax.rsqrt(jnp.maximum(pn2, _COS_EPS * _COS_EPS)).reshape(1, way * L)

    # --- lane/sublane-aligned slabs for the kernel ---
    WL = way * L
    WLp = _round_up(WL, 128)                               # pad proto lane dim to 128
    R = NQ * L
    block_rows = _round_up(min(block_rows_target, R), 8)   # multiple of 8 sublanes
    Rp = _round_up(R, block_rows)

    qc_slab = jnp.transpose(qc, (0, 2, 1)).reshape(R, C).astype(jnp.bfloat16)
    qc_slab = jnp.pad(qc_slab, ((0, Rp - R), (0, 0)))
    qinv_pad = jnp.pad(qinv, ((0, Rp - R), (0, 0)))

    pc_slab = jnp.transpose(pc, (1, 0, 2)).reshape(C, WL).astype(jnp.bfloat16)
    pc_slab = jnp.pad(pc_slab, ((0, 0), (0, WLp - WL)))
    pinv_pad = jnp.pad(pinv, ((0, 0), (0, WLp - WL)))

    sim_slab = _similarity_pallas(qc_slab, qinv_pad, pc_slab, pinv_pad, block_rows)

    # slice off padding, restore PyTorch layout [NQ, way, L, L]
    similarity_map = jnp.transpose(
        sim_slab[:R, :WL].reshape(NQ, L, way, L), (0, 2, 1, 3))

    # TODO(synk): emd_inference_opencv / emd_inference_qpth (LP-based optimal
    # transport flow solver) has no Pallas equivalent; logits below use
    # flow == 1, i.e. the raw similarity sum re-weighted by temperature/num_node.
    num_node = weight_1.shape[-1]
    logits = similarity_map.sum((-1, -2)) * (temperature / num_node)
    return logits, similarity_map, weight_1, weight_2


def _reference(support, query):
    """Pure-jnp reference of steps 1-4 (mirrors the kernel's bf16 MXU operands)."""
    proto = jnp.squeeze(support, axis=0)
    NQ, C, H, W = query.shape
    way = proto.shape[0]
    L = H * W
    q = query.reshape(NQ, C, L).astype(jnp.float32)
    p = proto.reshape(way, C, L).astype(jnp.float32)

    w1 = jnp.maximum(jnp.einsum('qcl,wc->qwl', q, p.mean(-1)), 0.0) + 0.001
    w2 = jnp.maximum(jnp.einsum('wcl,qc->wql', p, q.mean(-1)), 0.0) + 0.001

    qc = q - q.mean(1, keepdims=True)
    pc = p - p.mean(1, keepdims=True)
    dots = jnp.einsum('qcl,wck->qwlk', qc.astype(jnp.bfloat16), pc.astype(jnp.bfloat16),
                      preferred_element_type=jnp.float32)
    qn2 = jnp.sum(qc * qc, axis=1)                          # [NQ, L]
    pn2 = jnp.sum(pc * pc, axis=1)                          # [way, L]
    qinv = lax.rsqrt(jnp.maximum(qn2, _COS_EPS ** 2))
    pinv = lax.rsqrt(jnp.maximum(pn2, _COS_EPS ** 2))
    sim = dots * qinv[:, None, :, None] * pinv[None, :, None, :]
    return sim, w1, w2


if __name__ == "__main__":
    # Small shapes consistent with meta mode: support [1, way, C, H, W], query [NQ, C, H, W].
    # (Production DeepEMD shapes — way=5, NQ=75, C=640, H=W=5 — use the same kernel;
    #  there the row slab is 1875x640 processed in 256-row blocks against a 640x128 slab.)
    way, num_query, C, H, W = 2, 3, 64, 4, 4

    key = jax.random.PRNGKey(0)
    k1, k2 = jax.random.split(key)
    support = jax.random.normal(k1, (1, way, C, H, W), dtype=jnp.float32)
    query = jax.random.normal(k2, (num_query, C, H, W), dtype=jnp.float32)
    # Note: meta-mode forward uses no learned parameters (encoder / linear layers /
    # queue buffers of __init__ serve the other modes only).

    logits, sim, w1, w2 = deepemd_meta_forward(support, query, temperature=12.5)
    jax.block_until_ready((logits, sim, w1, w2))

    sim_ref, w1_ref, w2_ref = _reference(support, query)
    assert jnp.allclose(sim, sim_ref, rtol=1e-3, atol=1e-3), "similarity map mismatch"
    assert jnp.allclose(w1, w1_ref, rtol=1e-3, atol=1e-3), "weight_1 mismatch"
    assert jnp.allclose(w2, w2_ref, rtol=1e-3, atol=1e-3), "weight_2 mismatch"
    assert logits.shape == (num_query, way)

    print("KERNEL_OK")
</pallas_src>

<mosaic_0001>
module attributes {stable_mosaic.version = 11 : i64} {
  func.func @_sim_kernel(%arg0: i32, %arg1: memref<48x64xbf16, #tpu.memory_space<vmem>>, %arg2: memref<48x1xf32, #tpu.memory_space<vmem>>, %arg3: memref<64x128xbf16, #tpu.memory_space<vmem>>, %arg4: memref<1x128xf32, #tpu.memory_space<vmem>>, %arg5: memref<48x128xf32, #tpu.memory_space<vmem>>) attributes {dimension_semantics = [#tpu.dimension_semantics<parallel>], iteration_bounds = array<i64: 1>, scalar_prefetch = 0 : i64, scratch_operands = 0 : i64, tpu.core_type = #tpu.core_type<tc>, window_params = [{transform_indices = @transform_0, window_bounds = array<i64: 48, 64>}, {transform_indices = @transform_1, window_bounds = array<i64: 48, 1>}, {pipeline_mode = #tpu.pipeline_mode<synchronous>, transform_indices = @transform_2, window_bounds = array<i64: 64, 128>}, {pipeline_mode = #tpu.pipeline_mode<synchronous>, transform_indices = @transform_3, window_bounds = array<i64: 1, 128>}, {transform_indices = @transform_4, window_bounds = array<i64: 48, 128>}]} {
    %c0 = arith.constant 0 : index
    %c0_0 = arith.constant 0 : index
    %0 = vector.load %arg1[%c0, %c0_0] : memref<48x64xbf16, #tpu.memory_space<vmem>>, vector<48x64xbf16>
    %c0_1 = arith.constant 0 : index
    %c0_2 = arith.constant 0 : index
    %1 = vector.load %arg3[%c0_1, %c0_2] : memref<64x128xbf16, #tpu.memory_space<vmem>>, vector<64x128xbf16>
    %cst = arith.constant dense<0.000000e+00> : vector<48x128xf32>
    %2 = tpu.matmul %0, %1, %cst {dimension_numbers = #tpu.dot_dimension_numbers<[1], [0], [0], [1], [0, 0, 1, 1], [], []>} : vector<48x64xbf16>, vector<64x128xbf16>, vector<48x128xf32> -> vector<48x128xf32>
    %c0_3 = arith.constant 0 : index
    %c0_4 = arith.constant 0 : index
    %3 = vector.load %arg2[%c0_3, %c0_4] : memref<48x1xf32, #tpu.memory_space<vmem>>, vector<48x1xf32>
    %4 = vector.broadcast %3 : vector<48x1xf32> to vector<48x128xf32>
    %5 = arith.mulf %2, %4 : vector<48x128xf32>
    %c0_5 = arith.constant 0 : index
    %c0_6 = arith.constant 0 : index
    %6 = vector.load %arg4[%c0_5, %c0_6] : memref<1x128xf32, #tpu.memory_space<vmem>>, vector<1x128xf32>
    %7 = vector.broadcast %6 : vector<1x128xf32> to vector<48x128xf32>
    %8 = arith.mulf %5, %7 : vector<48x128xf32>
    %c0_7 = arith.constant 0 : index
    %c0_8 = arith.constant 0 : index
    %9 = vector.load %arg5[%c0_7, %c0_8] : memref<48x128xf32, #tpu.memory_space<vmem>>, vector<48x128xf32>
    tpu.vector_store %arg5[%c0_7, %c0_8], %8 {strides = array<i32>} : memref<48x128xf32, #tpu.memory_space<vmem>>, vector<48x128xf32>,
    return
  }
  func.func @transform_0(%arg0: i32) -> (i32, i32) {
    %c0_i32 = arith.constant 0 : i32
    %c0_i32_0 = arith.constant 0 : i32
    return %arg0, %c0_i32 : i32, i32
  }
  func.func @transform_1(%arg0: i32) -> (i32, i32) {
    %c0_i32 = arith.constant 0 : i32
    %c0_i32_0 = arith.constant 0 : i32
    return %arg0, %c0_i32 : i32, i32
  }
  func.func @transform_2(%arg0: i32) -> (i32, i32) {
    %c0_i32 = arith.constant 0 : i32
    %c0_i32_0 = arith.constant 0 : i32
    %c0_i32_1 = arith.constant 0 : i32
    return %c0_i32, %c0_i32_0 : i32, i32
  }
  func.func @transform_3(%arg0: i32) -> (i32, i32) {
    %c0_i32 = arith.constant 0 : i32
    %c0_i32_0 = arith.constant 0 : i32
    %c0_i32_1 = arith.constant 0 : i32
    return %c0_i32, %c0_i32_0 : i32, i32
  }
  func.func @transform_4(%arg0: i32) -> (i32, i32) {
    %c0_i32 = arith.constant 0 : i32
    %c0_i32_0 = arith.constant 0 : i32
    return %arg0, %c0_i32 : i32, i32
  }
}

</mosaic_0001>

<bundles_post_ra>
// kernel: tpu_custom_call.1
= control target key start
LH: loop header
LB: loop body
LE: loop exit
PB: predicated region body
PF: predicated region fallthrough
CT: control target
= control target key end

     0   :  { %v301_v1 = vmov 0.0   ;;  %vm302_vm0 = vmmov 0   ;;  %v303_v3 = vmov 0   ;;  %s389_s0 = inlined_call_operand.vmem [shape: bf16[48,64], index: 0, kind: input, shape index: {}]   ;;  %s390_s1 = inlined_call_operand.vmem [shape: f32[48,1], index: 1, kind: input, shape index: {}]   ;;  %s391_s2 = inlined_call_operand.vmem [shape: bf16[64,128], index: 2, kind: input, shape index: {}]   ;;  %s392_s3 = inlined_call_operand.vmem [shape: f32[1,128], index: 3, kind: input, shape index: {}]   ;;  %s393_s4 = inlined_call_operand.hbm [shape: f32[48,128], index: 4, kind: output, shape index: {}]  }
   0x1   :  { %v270_v0 = vld [vmem:[%s391_s2] sm:$0xff]   ;;  %234 = vmatprep.subr.bf16.mxu0 %v301_v1  ;;  %254 = vmatprep.subr.bf16.mxu1 %v301_v1  ;;  %v271_v2 = vld [vmem:[%s391_s2 + $0x8] sm:$0xff]   ;;  %v272_v4 = vld [vmem:[%s391_s2 + $0x10] sm:$0xff]  }
   0x2   :  { %235 = vmatpush3.bf16.msra.mxu0 %v270_v0  ;;  %258 = vmatpush3.bf16.msra.mxu1 %v270_v0  ;;  %v141_v5 = vld [vmem:[%s390_s1 + $0x10] sm:$0xff]  ;;  %v139_v6 = vld [vmem:[%s390_s1] sm:$0xff]  ;;  %v142_v7 = vld [vmem:[%s390_s1 + $0x18] sm:$0xff] }
   0x3   :  { %236 = vmatprep.subr.bf16.mxu0 %v301_v1  ;;  %255 = vmatprep.subr.bf16.mxu1 %v301_v1  ;;  %v140_v8 = vld [vmem:[%s390_s1 + $0x8] sm:$0xff] }
   0x4   :  { %242 = vmatprep.mubr.msk.bf16.mxu0 %vm302_vm0, %v301_v1  ;;  %246 = vmatprep.mubr.msk.bf16.mxu1 %vm302_vm0, %v301_v1 }
   0x5   :  { %269 = vset.pattern.permute.xlu1 %v303_v3  ;;  %268 = vset.pattern.permute.xlu0 %v303_v3 }
   0x6   :  { %237 = vmatpush3.bf16.msra.mxu0 %v271_v2  ;;  %259 = vmatpush3.bf16.msra.mxu1 %v271_v2 }
   0x7   :  { %238 = vmatprep.subr.bf16.mxu0 %v301_v1  ;;  %256 = vmatprep.subr.bf16.mxu1 %v301_v1 }
   0x8   :  { %157 = vperm.xlu1 %269, %v141_v5   ;;  %147 = vperm.xlu0 %268, %v139_v6  }
   0x9   :  { %9 = vsyncpa [#allocation3], 0  ;;  %v273_v9 = vld [vmem:[%s391_s2 + $0x18] sm:$0xff]   ;;  %v274_v10 = vld [vmem:[%s389_s0] sm:$0xff]   ;;  %vm72_vm1 = vcmask 523264  }
   0xa   :  { %239 = vmatpush3.bf16.msra.mxu0 %v272_v4  ;;  %260 = vmatpush3.bf16.msra.mxu1 %v272_v4  ;;  %v275_v11 = vld [vmem:[%s389_s0 + $0x8] sm:$0xff]   ;;  %v143_v13 = vld [vmem:[%s390_s1 + $0x20] sm:$0xff]  ;;  %v276_v14 = vld [vmem:[%s389_s0 + $0x10] sm:$0xff]   ;;  %s304_s0 = smov [#allocation2]  }
   0xb   :  { %240 = vmatprep.subr.bf16.mxu0 %v301_v1  ;;  %257 = vmatprep.subr.bf16.mxu1 %v301_v1  ;;  %v144_v12 = vld [vmem:[%s390_s1 + $0x28] sm:$0xff]  ;;  %v226_v20 = vld [vmem:[%s392_s3] ss:$0 sm:$0xff]  ;;  %s205_s3 = sshll.u32 %s304_s0, 4  ;;  %s206_s3 = int_to_ptr.vmem [resolvable:$true] %s205_s3 }
   0xc   :  { %162 = vperm.xlu1 %269, %v142_v7   ;;  %152 = vperm.xlu0 %268, %v140_v8   ;;  %s277_s15 = scalar_lea.vmem %s206_s3, 768  ;;  %p282_p1 = scmp.lt.s32.totalorder %s206_s3, %s206_s3 }
   0xd   :  { %p278_p0 = scmp.ne.s32.totalorder %s206_s3, %s277_s15  ;;  %p283_p2 = scmp.lt.s32.totalorder %s277_s15, %s277_s15 }
   0xe   :  { %241 = vmatpush3.bf16.msra.mxu0 %v273_v9  ;;  %261 = vmatpush3.bf16.msra.mxu1 %v273_v9 }
   0xf   :  { %p284_p3 = por %p283_p2, %p282_p1 }
  0x10   :  { %172 = vperm.xlu1 %269, %v144_v12   ;;  %167 = vperm.xlu0 %268, %v143_v13  }
  0x11   :  { %243 = vmatmul.mubr.msk.bf16.vlgmr.msra.gmra.mrb[0].mxu0 %vm72_vm1, %v274_v10  ;;  %247 = vmatmul.mubr.msk.bf16.vlgmr.msra.gmra.mrb[0].mxu1 %vm72_vm1, %v275_v11  ;;  %p285_p4 = pnand %p284_p3, %p278_p0 }
  0x12   :  { %250 = vmatprep.mubr.msk.bf16.mxu1 %vm302_vm0, %v301_v1 }
  0x19   :  { %251 = vmatmul.mubr.msk.bf16.gmra.mrb[4].mxu1 %vm72_vm1, %v276_v14 }
  0x87   :  { %v158_v15 = vpop.permute.xlu1 %157  ;;  %v148_v16 = vpop.permute.xlu0 %147 }
  0x8b   :  { %v163_v17 = vpop.permute.xlu1 %162  ;;  %v153_v18 = vpop.permute.xlu0 %152 }
  0x8f   :  { %v168_v36 = vpop.permute.xlu0 %167  ;;  %v173_v40 = vpop.permute.xlu1 %172 }
  0xe4   :  { %v116_v19 = vpop.f32.mrb[0].mxu0  ;;  %v124_v21 = vpop.f32.mrb[0].mxu1 }
  0xe5   :  { %v175_v22 = vmul.f32 %v148_v16, %v116_v19  ;;  %v177_v23 = vmul.f32 %v158_v15, %v124_v21  ;;  %v244_v24 = vpop.f32.mrb[1].mxu0  ;;  %v248_v25 = vpop.f32.mrb[1].mxu1 }
  0xe6   :  { %v119_v26 = vpop.f32.mrb[2].mxu0  ;;  %v127_v27 = vpop.f32.mrb[2].mxu1 }
  0xe7   :  { %v188_v28 = vmul.f32 %v226_v20, %v175_v22  ;;  %v190_v29 = vmul.f32 %v226_v20, %v177_v23  ;;  %v176_v30 = vmul.f32 %v153_v18, %v119_v26  ;;  %v178_v31 = vmul.f32 %v163_v17, %v127_v27  ;;  %v249_v32 = vpop.f32.mrb[3].mxu1  ;;  %v245_v33 = vpop.f32.mrb[3].mxu0 }
  0xe9   :  { %194 = vst [vmem:[#allocation2] sm:$0xff] %v188_v28  ;;  %196 = vst [vmem:[#allocation2 + $0x10] sm:$0xff] %v190_v29  ;;  %v189_v34 = vmul.f32 %v226_v20, %v176_v30  ;;  %v191_v35 = vmul.f32 %v226_v20, %v178_v31 }
  0xeb   :  { %195 = vst [vmem:[#allocation2 + $0x8] sm:$0xff] %v189_v34  ;;  %197 = vst [vmem:[#allocation2 + $0x18] sm:$0xff] %v191_v35 }
  0xec   :  { %v132_v37 = vpop.f32.mrb[4].mxu1 }
  0xed   :  { %v179_v38 = vmul.f32 %v168_v36, %v132_v37  ;;  %v252_v39 = vpop.f32.mrb[5].mxu1 }
  0xee   :  { %v135_v41 = vpop.f32.mrb[6].mxu1 }
  0xef   :  { %v192_v42 = vmul.f32 %v226_v20, %v179_v38  ;;  %v180_v43 = vmul.f32 %v173_v40, %v135_v41  ;;  %v253_v44 = vpop.f32.mrb[7].mxu1 }
  0xf1   :  { %198 = vst [vmem:[#allocation2 + $0x20] sm:$0xff] %v192_v42  ;;  %v193_v45 = vmul.f32 %v226_v20, %v180_v43 }
  0xf3   :  { %199 = vst [vmem:[#allocation2 + $0x28] sm:$0xff] %v193_v45 }
  0xf4   :  { %288 = shalt.err (!%p285_p4)
}
  0xf5   :  { %s289_s18 = scalar_lea.hbm %s393_s4, 768 }
  0xf6   :  { %p290_p5 = scmp.ne.s32.totalorder %s393_s4, %s289_s18  ;;  %p293_p6 = scmp.lt.u32.totalorder %s289_s18, %s393_s4 }
  0xf8   :  { %p295_p7 = pnand %p293_p6, %p290_p5 }
  0xfa   :  { %298 = shalt.err (!%p295_p7)
}
  0xfb   :  { %s305_s23 = smov 128   ;;  %s306_s24 = smov 8  }
  0xfc   :  { %211 = dma.vmem_to_hbm [thread:$0]  %s206_s3, 768, %s393_s4, [#allocation3], %s305_s23, %s305_s23, %s306_s24  }
  0xfd   :  { %299 = dma.done.wait [#allocation3], 768  }
  0xfe   :  { %300 = vsyncadd [#allocation3], 4294966528 }
  0xff   :  { %215 = vsyncpa [#allocation3], 1 }

</bundles_post_ra>
